<compile_context>
chip_gen: v7x
topology: tpu7x:2x2x1
jax: 0.10.0
libtpu: 0.0.40
codegen_flags: <defaults>
</compile_context>

<pallas_src>
import jax
import jax.numpy as jnp
from jax.experimental import pallas as pl
from jax.experimental.pallas import tpu as pltpu

LANE = 128
SUBLANE = 8


def _round_up(x, m):
    return (x + m - 1) // m * m


def neural_lm3_kernel(x_ref, w1_ref, b1_ref, w2_ref, b2_ref, w3_ref, b3_ref,
                      o_ref, h2_ref):
    """Fused 3-layer MLP for one (batch, vocab) tile.

    Grid is (batch_tiles, vocab_tiles).  The hidden activations depend only on
    the batch tile, so they are computed once per batch tile (at j == 0) into
    the VMEM scratch `h2_ref` and reused for every vocab tile.  When the batch
    tile is large enough it is processed as two independent sub-chunks so the
    VPU epilogue of one chunk overlaps the next chunk's MXU matmul.
    """
    tb = x_ref.shape[0]
    n_chunks = 2 if (tb % 16 == 0) else 1
    cb = tb // n_chunks

    @pl.when(pl.program_id(1) == 0)
    def _compute_hidden():
        w1 = w1_ref[...]
        b1 = b1_ref[...]
        w2 = w2_ref[...]
        b2 = b2_ref[...]
        for c in range(n_chunks):
            lo, hi = c * cb, (c + 1) * cb
            h1 = jnp.dot(x_ref[lo:hi, :], w1,
                         preferred_element_type=jnp.float32) + b1
            h1 = jnp.maximum(h1, 0.0).astype(jnp.bfloat16)
            h2 = jnp.dot(h1, w2, preferred_element_type=jnp.float32) + b2
            h2_ref[lo:hi, :] = jnp.maximum(h2, 0.0).astype(jnp.bfloat16)

    w3 = w3_ref[...]
    b3 = b3_ref[...]
    for c in range(n_chunks):
        lo, hi = c * cb, (c + 1) * cb
        logits = jnp.dot(h2_ref[lo:hi, :], w3,
                         preferred_element_type=jnp.float32) + b3
        o_ref[lo:hi, :] = logits.astype(o_ref.dtype)


def _vmem_limit_bytes():
    """Per-generation scoped-VMEM limit with headroom below physical."""
    phys = 64 * 1024 * 1024  # conservative default (v7x per-TC VMEM)
    try:
        cap = getattr(pltpu.get_tpu_info(), "vmem_capacity_bytes", None)
        if cap:
            phys = int(cap)
    except Exception:
        pass
    # ~100 MiB on 128-MiB parts (v5e/v6e), ~51 MiB on 64-MiB v7x.
    return min(100 * 1024 * 1024, (phys * 4) // 5)


def neural_lm3_forward(x, prepped_params, *, out_dim, tile_b=None, tile_n=None,
                       out_dtype=jnp.float32):
    """Fused forward pass.  `prepped_params` come from `prepare_params`
    (lane-padded, bf16 weights, f32 biases).  Returns logits of shape
    (batch, out_dim) in `out_dtype` (default f32, matching the PyTorch module).
    """
    w1, b1, w2, b2, w3, b3 = prepped_params
    batch, in_dim = x.shape
    k1 = w1.shape[0]      # padded input dim
    d1 = w1.shape[1]      # padded hidden_dim[0]
    d2 = w2.shape[1]      # padded hidden_dim[1]
    dv = w3.shape[1]      # padded vocab

    # Cast x to bf16 once in the wrapper; pad only the feature dim to the
    # lane-padded K and the batch to a sublane multiple.  The batch remainder
    # w.r.t. tile_b is handled by the cdiv grid (edge tile), not by padding.
    pb = _round_up(max(batch, 1), SUBLANE)
    xp = jnp.pad(x.astype(jnp.bfloat16),
                 ((0, pb - batch), (0, k1 - in_dim)))

    if tile_b is None:
        if pb <= SUBLANE:
            tile_b = SUBLANE
        else:
            # Aim for >=2 grid steps along batch (keeps both v7x TensorCores
            # busy) while using large tiles (up to 512 rows) so the pipeline
            # runs near the HBM roofline.
            tile_b = min(512, _round_up(pl.cdiv(pb, 2), SUBLANE))
    else:
        tile_b = min(_round_up(max(int(tile_b), 1), SUBLANE), pb)

    if tile_n is None:
        tile_n = min(dv, 2048)
    else:
        tile_n = min(_round_up(max(int(tile_n), 1), LANE), dv)

    grid = (pl.cdiv(pb, tile_b), pl.cdiv(dv, tile_n))

    flops = 2 * pb * (k1 * d1 + d1 * d2 + d2 * dv)
    bytes_accessed = (int(xp.size) * xp.dtype.itemsize
                      + pb * dv * jnp.dtype(out_dtype).itemsize
                      + sum(int(p.size) * p.dtype.itemsize
                            for p in prepped_params))

    x_map = lambda i, j: (i, 0)      # batch-tiled; same block across j (no re-DMA)
    const_map = lambda i, j: (0, 0)  # fully resident W1/b1/W2/b2
    n_map = lambda i, j: (0, j)      # vocab-tiled W3/b3
    out_map = lambda i, j: (i, j)

    def run(single_buffer_resident):
        # Constant-index operands never change block, so a second pipeline
        # buffer is dead VMEM; request single buffering for them.
        kw = ({"pipeline_mode": pl.Buffered(1)}
              if single_buffer_resident else {})
        in_specs = [
            pl.BlockSpec((tile_b, k1), x_map),
            pl.BlockSpec((k1, d1), const_map, **kw),
            pl.BlockSpec((1, d1), const_map, **kw),
            pl.BlockSpec((d1, d2), const_map, **kw),
            pl.BlockSpec((1, d2), const_map, **kw),
            pl.BlockSpec((d2, tile_n), n_map),
            pl.BlockSpec((1, tile_n), n_map),
        ]
        return pl.pallas_call(
            neural_lm3_kernel,
            out_shape=jax.ShapeDtypeStruct((pb, dv), out_dtype),
            grid_spec=pltpu.PrefetchScalarGridSpec(
                num_scalar_prefetch=0,
                grid=grid,
                in_specs=in_specs,
                out_specs=pl.BlockSpec((tile_b, tile_n), out_map),
                scratch_shapes=[pltpu.VMEM((tile_b, d2), jnp.bfloat16)],
            ),
            compiler_params=pltpu.CompilerParams(
                dimension_semantics=("parallel", "arbitrary"),
                vmem_limit_bytes=_vmem_limit_bytes(),
            ),
            cost_estimate=pl.CostEstimate(
                flops=flops, transcendentals=0,
                bytes_accessed=bytes_accessed),
        )(xp, w1, b1, w2, b2, w3, b3)

    try:
        out = run(single_buffer_resident=True)
    except Exception:
        # Fallback if this Pallas build rejects pl.Buffered(1) on the
        # top-level grid: default double-buffered resident operands.
        out = run(single_buffer_resident=False)

    return out[:batch, :out_dim]


def init_params(key, input_dim, hidden_dim, vocab_size):
    """nn.Linear-style init; weights stored transposed as (in, out), f32."""
    dims = [input_dim, hidden_dim[0], hidden_dim[1], vocab_size]
    params = []
    for i in range(3):
        key, kw, kb = jax.random.split(key, 3)
        fan_in, fan_out = dims[i], dims[i + 1]
        bound = 1.0 / jnp.sqrt(fan_in)
        w = jax.random.uniform(kw, (fan_in, fan_out), jnp.float32,
                               -bound, bound)
        b = jax.random.uniform(kb, (1, fan_out), jnp.float32, -bound, bound)
        params.extend([w, b])
    return tuple(params)


def prepare_params(raw_params, input_dim, hidden_dim, vocab_size):
    """One-time packing for the kernel: zero-pad every feature/contraction dim
    to a multiple of 128 (lane-dense tiles) and cast weights to bf16 for the
    MXU.  Biases stay f32 (bias add / ReLU run in f32)."""
    w1, b1, w2, b2, w3, b3 = raw_params
    k1 = _round_up(input_dim, LANE)
    d1 = _round_up(hidden_dim[0], LANE)
    d2 = _round_up(hidden_dim[1], LANE)
    dv = _round_up(vocab_size, LANE)

    def pad2(a, rows, cols):
        out = jnp.zeros((rows, cols), a.dtype)
        return out.at[:a.shape[0], :a.shape[1]].set(a)

    return (
        pad2(w1, k1, d1).astype(jnp.bfloat16), pad2(b1, 1, d1),
        pad2(w2, d1, d2).astype(jnp.bfloat16), pad2(b2, 1, d2),
        pad2(w3, d2, dv).astype(jnp.bfloat16), pad2(b3, 1, dv),
    )


def reference_forward(x, raw_params):
    """Plain-JAX reference mirroring the kernel math (bf16 MXU operands,
    f32 accumulation) on the unpadded parameters."""
    w1, b1, w2, b2, w3, b3 = raw_params
    h1 = jnp.maximum(
        jnp.dot(x.astype(jnp.bfloat16), w1.astype(jnp.bfloat16),
                preferred_element_type=jnp.float32) + b1, 0.0)
    h2 = jnp.maximum(
        jnp.dot(h1.astype(jnp.bfloat16), w2.astype(jnp.bfloat16),
                preferred_element_type=jnp.float32) + b2, 0.0)
    return (jnp.dot(h2.astype(jnp.bfloat16), w3.astype(jnp.bfloat16),
                    preferred_element_type=jnp.float32) + b3)


if __name__ == "__main__":
    # Small shapes consistent with the module's constructor:
    # NeuralLM3(input_dim=32, hidden_dim=[64, 256], vocab_size=128), batch=8.
    batch, input_dim = 8, 32
    hidden_dim = (64, 256)
    vocab_size = 128

    key = jax.random.PRNGKey(0)
    key, kx = jax.random.split(key)
    x = jax.random.normal(kx, (batch, input_dim), jnp.float32)

    raw_params = init_params(key, input_dim, hidden_dim, vocab_size)
    params = prepare_params(raw_params, input_dim, hidden_dim, vocab_size)

    out = neural_lm3_forward(x, params, out_dim=vocab_size)
    out = jax.block_until_ready(out)

    ref = reference_forward(x, raw_params)
    assert out.shape == (batch, vocab_size)
    assert jnp.allclose(out, ref, atol=1e-3, rtol=1e-3), \
        float(jnp.max(jnp.abs(out - ref)))

    print("KERNEL_OK")
</pallas_src>

<mosaic_0001>
module attributes {stable_mosaic.version = 11 : i64} {
  func.func @neural_lm3_kernel(%arg0: i32, %arg1: i32, %arg2: memref<8x128xbf16, #tpu.memory_space<vmem>>, %arg3: memref<128x128xbf16, #tpu.memory_space<vmem>>, %arg4: memref<1x128xf32, #tpu.memory_space<vmem>>, %arg5: memref<128x256xbf16, #tpu.memory_space<vmem>>, %arg6: memref<1x256xf32, #tpu.memory_space<vmem>>, %arg7: memref<256x128xbf16, #tpu.memory_space<vmem>>, %arg8: memref<1x128xf32, #tpu.memory_space<vmem>>, %arg9: memref<8x128xf32, #tpu.memory_space<vmem>>, %arg10: memref<8x256xbf16, #tpu.memory_space<vmem>>) attributes {dimension_semantics = [#tpu.dimension_semantics<parallel>, #tpu.dimension_semantics<arbitrary>], iteration_bounds = array<i64: 1, 1>, scalar_prefetch = 0 : i64, scratch_operands = 1 : i64, tpu.core_type = #tpu.core_type<tc>, window_params = [{transform_indices = @transform_0, window_bounds = array<i64: 8, 128>}, {pipeline_mode = #tpu.pipeline_mode<synchronous>, transform_indices = @transform_1, window_bounds = array<i64: 128, 128>}, {pipeline_mode = #tpu.pipeline_mode<synchronous>, transform_indices = @transform_2, window_bounds = array<i64: 1, 128>}, {pipeline_mode = #tpu.pipeline_mode<synchronous>, transform_indices = @transform_3, window_bounds = array<i64: 128, 256>}, {pipeline_mode = #tpu.pipeline_mode<synchronous>, transform_indices = @transform_4, window_bounds = array<i64: 1, 256>}, {transform_indices = @transform_5, window_bounds = array<i64: 256, 128>}, {transform_indices = @transform_6, window_bounds = array<i64: 1, 128>}, {transform_indices = @transform_7, window_bounds = array<i64: 8, 128>}]} {
    %c0_i32 = arith.constant 0 : i32
    %0 = arith.cmpi eq, %arg1, %c0_i32 : i32
    %1 = arith.extui %0 : i1 to i32
    %c0_i32_0 = arith.constant 0 : i32
    %2 = arith.cmpi ne, %1, %c0_i32_0 : i32
    scf.if %2 {
      %c0_8 = arith.constant 0 : index
      %c0_9 = arith.constant 0 : index
      %10 = vector.load %arg3[%c0_8, %c0_9] : memref<128x128xbf16, #tpu.memory_space<vmem>>, vector<128x128xbf16>
      %c0_10 = arith.constant 0 : index
      %c0_11 = arith.constant 0 : index
      %11 = vector.load %arg4[%c0_10, %c0_11] : memref<1x128xf32, #tpu.memory_space<vmem>>, vector<1x128xf32>
      %c0_12 = arith.constant 0 : index
      %c0_13 = arith.constant 0 : index
      %12 = vector.load %arg5[%c0_12, %c0_13] : memref<128x256xbf16, #tpu.memory_space<vmem>>, vector<128x256xbf16>
      %c0_14 = arith.constant 0 : index
      %c0_15 = arith.constant 0 : index
      %13 = vector.load %arg6[%c0_14, %c0_15] : memref<1x256xf32, #tpu.memory_space<vmem>>, vector<1x256xf32>
      %c0_16 = arith.constant 0 : index
      %c0_17 = arith.constant 0 : index
      %14 = vector.load %arg2[%c0_16, %c0_17] : memref<8x128xbf16, #tpu.memory_space<vmem>>, vector<8x128xbf16>
      %cst_18 = arith.constant dense<0.000000e+00> : vector<8x128xf32>
      %15 = tpu.matmul %14, %10, %cst_18 {dimension_numbers = #tpu.dot_dimension_numbers<[1], [0], [0], [1], [0, 0, 1, 1], [], []>} : vector<8x128xbf16>, vector<128x128xbf16>, vector<8x128xf32> -> vector<8x128xf32>
      %16 = vector.broadcast %11 : vector<1x128xf32> to vector<8x128xf32>
      %17 = arith.addf %15, %16 : vector<8x128xf32>
      %cst_19 = arith.constant 0.000000e+00 : f32
      %18 = vector.broadcast %cst_19 : f32 to vector<8x128xf32>
      %19 = arith.maximumf %17, %18 : vector<8x128xf32>
      %20 = arith.truncf %19 : vector<8x128xf32> to vector<8x128xbf16>
      %cst_20 = arith.constant dense<0.000000e+00> : vector<8x256xf32>
      %21 = tpu.matmul %20, %12, %cst_20 {dimension_numbers = #tpu.dot_dimension_numbers<[1], [0], [0], [1], [0, 0, 1, 1], [], []>} : vector<8x128xbf16>, vector<128x256xbf16>, vector<8x256xf32> -> vector<8x256xf32>
      %22 = vector.broadcast %13 : vector<1x256xf32> to vector<8x256xf32>
      %23 = arith.addf %21, %22 : vector<8x256xf32>
      %cst_21 = arith.constant 0.000000e+00 : f32
      %24 = vector.broadcast %cst_21 : f32 to vector<8x256xf32>
      %25 = arith.maximumf %23, %24 : vector<8x256xf32>
      %26 = arith.truncf %25 : vector<8x256xf32> to vector<8x256xbf16>
      %c0_22 = arith.constant 0 : index
      %c0_23 = arith.constant 0 : index
      %27 = vector.load %arg10[%c0_22, %c0_23] : memref<8x256xbf16, #tpu.memory_space<vmem>>, vector<8x256xbf16>
      tpu.vector_store %arg10[%c0_22, %c0_23], %26 {strides = array<i32>} : memref<8x256xbf16, #tpu.memory_space<vmem>>, vector<8x256xbf16>,
    } else {
    }
    %c0 = arith.constant 0 : index
    %c0_1 = arith.constant 0 : index
    %3 = vector.load %arg7[%c0, %c0_1] : memref<256x128xbf16, #tpu.memory_space<vmem>>, vector<256x128xbf16>
    %c0_2 = arith.constant 0 : index
    %c0_3 = arith.constant 0 : index
    %4 = vector.load %arg8[%c0_2, %c0_3] : memref<1x128xf32, #tpu.memory_space<vmem>>, vector<1x128xf32>
    %c0_4 = arith.constant 0 : index
    %c0_5 = arith.constant 0 : index
    %5 = vector.load %arg10[%c0_4, %c0_5] : memref<8x256xbf16, #tpu.memory_space<vmem>>, vector<8x256xbf16>
    %cst = arith.constant dense<0.000000e+00> : vector<8x128xf32>
    %6 = tpu.matmul %5, %3, %cst {dimension_numbers = #tpu.dot_dimension_numbers<[1], [0], [0], [1], [0, 0, 1, 1], [], []>} : vector<8x256xbf16>, vector<256x128xbf16>, vector<8x128xf32> -> vector<8x128xf32>
    %7 = vector.broadcast %4 : vector<1x128xf32> to vector<8x128xf32>
    %8 = arith.addf %6, %7 : vector<8x128xf32>
    %c0_6 = arith.constant 0 : index
    %c0_7 = arith.constant 0 : index
    %9 = vector.load %arg9[%c0_6, %c0_7] : memref<8x128xf32, #tpu.memory_space<vmem>>, vector<8x128xf32>
    tpu.vector_store %arg9[%c0_6, %c0_7], %8 {strides = array<i32>} : memref<8x128xf32, #tpu.memory_space<vmem>>, vector<8x128xf32>,
    return
  }
  func.func @transform_0(%arg0: i32, %arg1: i32) -> (i32, i32) {
    %c0_i32 = arith.constant 0 : i32
    %c0_i32_0 = arith.constant 0 : i32
    return %arg0, %c0_i32 : i32, i32
  }
  func.func @transform_1(%arg0: i32, %arg1: i32) -> (i32, i32) {
    %c0_i32 = arith.constant 0 : i32
    %c0_i32_0 = arith.constant 0 : i32
    %c0_i32_1 = arith.constant 0 : i32
    return %c0_i32, %c0_i32_0 : i32, i32
  }
  func.func @transform_2(%arg0: i32, %arg1: i32) -> (i32, i32) {
    %c0_i32 = arith.constant 0 : i32
    %c0_i32_0 = arith.constant 0 : i32
    %c0_i32_1 = arith.constant 0 : i32
    return %c0_i32, %c0_i32_0 : i32, i32
  }
  func.func @transform_3(%arg0: i32, %arg1: i32) -> (i32, i32) {
    %c0_i32 = arith.constant 0 : i32
    %c0_i32_0 = arith.constant 0 : i32
    %c0_i32_1 = arith.constant 0 : i32
    return %c0_i32, %c0_i32_0 : i32, i32
  }
  func.func @transform_4(%arg0: i32, %arg1: i32) -> (i32, i32) {
    %c0_i32 = arith.constant 0 : i32
    %c0_i32_0 = arith.constant 0 : i32
    %c0_i32_1 = arith.constant 0 : i32
    return %c0_i32, %c0_i32_0 : i32, i32
  }
  func.func @transform_5(%arg0: i32, %arg1: i32) -> (i32, i32) {
    %c0_i32 = arith.constant 0 : i32
    %c0_i32_0 = arith.constant 0 : i32
    return %c0_i32, %arg1 : i32, i32
  }
  func.func @transform_6(%arg0: i32, %arg1: i32) -> (i32, i32) {
    %c0_i32 = arith.constant 0 : i32
    %c0_i32_0 = arith.constant 0 : i32
    return %c0_i32, %arg1 : i32, i32
  }
  func.func @transform_7(%arg0: i32, %arg1: i32) -> (i32, i32) {
    %c0_i32 = arith.constant 0 : i32
    return %arg0, %arg1 : i32, i32
  }
}

module attributes {stable_mosaic.version = 11 : i64} {
  func.func @neural_lm3_kernel(%arg0: i32, %arg1: i32, %arg2: memref<8x128xbf16, #tpu.memory_space<vmem>>, %arg3: memref<128x128xbf16, #tpu.memory_space<vmem>>, %arg4: memref<1x128xf32, #tpu.memory_space<vmem>>, %arg5: memref<128x256xbf16, #tpu.memory_space<vmem>>, %arg6: memref<1x256xf32, #tpu.memory_space<vmem>>, %arg7: memref<256x128xbf16, #tpu.memory_space<vmem>>, %arg8: memref<1x128xf32, #tpu.memory_space<vmem>>, %arg9: memref<8x128xf32, #tpu.memory_space<vmem>>, %arg10: memref<8x256xbf16, #tpu.memory_space<vmem>>) attributes {dimension_semantics = [#tpu.dimension_semantics<parallel>, #tpu.dimension_semantics<arbitrary>], iteration_bounds = array<i64: 1, 1>, scalar_prefetch = 0 : i64, scratch_operands = 1 : i64, tpu.core_type = #tpu.core_type<tc>, window_params = [{transform_indices = @transform_0, window_bounds = array<i64: 8, 128>}, {pipeline_mode = #tpu.pipeline_mode<synchronous>, transform_indices = @transform_1, window_bounds = array<i64: 128, 128>}, {pipeline_mode = #tpu.pipeline_mode<synchronous>, transform_indices = @transform_2, window_bounds = array<i64: 1, 128>}, {pipeline_mode = #tpu.pipeline_mode<synchronous>, transform_indices = @transform_3, window_bounds = array<i64: 128, 256>}, {pipeline_mode = #tpu.pipeline_mode<synchronous>, transform_indices = @transform_4, window_bounds = array<i64: 1, 256>}, {transform_indices = @transform_5, window_bounds = array<i64: 256, 128>}, {transform_indices = @transform_6, window_bounds = array<i64: 1, 128>}, {transform_indices = @transform_7, window_bounds = array<i64: 8, 128>}]} {
    %c0_i32 = arith.constant 0 : i32
    %0 = arith.cmpi eq, %arg1, %c0_i32 : i32
    %1 = arith.extui %0 : i1 to i32
    %c0_i32_0 = arith.constant 0 : i32
    %2 = arith.cmpi ne, %1, %c0_i32_0 : i32
    scf.if %2 {
      %c0_8 = arith.constant 0 : index
      %c0_9 = arith.constant 0 : index
      %10 = vector.load %arg3[%c0_8, %c0_9] : memref<128x128xbf16, #tpu.memory_space<vmem>>, vector<128x128xbf16>
      %c0_10 = arith.constant 0 : index
      %c0_11 = arith.constant 0 : index
      %11 = vector.load %arg4[%c0_10, %c0_11] : memref<1x128xf32, #tpu.memory_space<vmem>>, vector<1x128xf32>
      %c0_12 = arith.constant 0 : index
      %c0_13 = arith.constant 0 : index
      %12 = vector.load %arg5[%c0_12, %c0_13] : memref<128x256xbf16, #tpu.memory_space<vmem>>, vector<128x256xbf16>
      %c0_14 = arith.constant 0 : index
      %c0_15 = arith.constant 0 : index
      %13 = vector.load %arg6[%c0_14, %c0_15] : memref<1x256xf32, #tpu.memory_space<vmem>>, vector<1x256xf32>
      %c0_16 = arith.constant 0 : index
      %c0_17 = arith.constant 0 : index
      %14 = vector.load %arg2[%c0_16, %c0_17] : memref<8x128xbf16, #tpu.memory_space<vmem>>, vector<8x128xbf16>
      %cst_18 = arith.constant dense<0.000000e+00> : vector<8x128xf32>
      %15 = tpu.matmul %14, %10, %cst_18 {dimension_numbers = #tpu.dot_dimension_numbers<[1], [0], [0], [1], [0, 0, 1, 1], [], []>} : vector<8x128xbf16>, vector<128x128xbf16>, vector<8x128xf32> -> vector<8x128xf32>
      %16 = vector.broadcast %11 : vector<1x128xf32> to vector<8x128xf32>
      %17 = arith.addf %15, %16 : vector<8x128xf32>
      %cst_19 = arith.constant 0.000000e+00 : f32
      %18 = vector.broadcast %cst_19 : f32 to vector<8x128xf32>
      %19 = arith.maximumf %17, %18 : vector<8x128xf32>
      %20 = arith.truncf %19 : vector<8x128xf32> to vector<8x128xbf16>
      %cst_20 = arith.constant dense<0.000000e+00> : vector<8x256xf32>
      %21 = tpu.matmul %20, %12, %cst_20 {dimension_numbers = #tpu.dot_dimension_numbers<[1], [0], [0], [1], [0, 0, 1, 1], [], []>} : vector<8x128xbf16>, vector<128x256xbf16>, vector<8x256xf32> -> vector<8x256xf32>
      %22 = vector.broadcast %13 : vector<1x256xf32> to vector<8x256xf32>
      %23 = arith.addf %21, %22 : vector<8x256xf32>
      %cst_21 = arith.constant 0.000000e+00 : f32
      %24 = vector.broadcast %cst_21 : f32 to vector<8x256xf32>
      %25 = arith.maximumf %23, %24 : vector<8x256xf32>
      %26 = arith.truncf %25 : vector<8x256xf32> to vector<8x256xbf16>
      %c0_22 = arith.constant 0 : index
      %c0_23 = arith.constant 0 : index
      %27 = vector.load %arg10[%c0_22, %c0_23] : memref<8x256xbf16, #tpu.memory_space<vmem>>, vector<8x256xbf16>
      tpu.vector_store %arg10[%c0_22, %c0_23], %26 {strides = array<i32>} : memref<8x256xbf16, #tpu.memory_space<vmem>>, vector<8x256xbf16>,
    } else {
    }
    %c0 = arith.constant 0 : index
    %c0_1 = arith.constant 0 : index
    %3 = vector.load %arg7[%c0, %c0_1] : memref<256x128xbf16, #tpu.memory_space<vmem>>, vector<256x128xbf16>
    %c0_2 = arith.constant 0 : index
    %c0_3 = arith.constant 0 : index
    %4 = vector.load %arg8[%c0_2, %c0_3] : memref<1x128xf32, #tpu.memory_space<vmem>>, vector<1x128xf32>
    %c0_4 = arith.constant 0 : index
    %c0_5 = arith.constant 0 : index
    %5 = vector.load %arg10[%c0_4, %c0_5] : memref<8x256xbf16, #tpu.memory_space<vmem>>, vector<8x256xbf16>
    %cst = arith.constant dense<0.000000e+00> : vector<8x128xf32>
    %6 = tpu.matmul %5, %3, %cst {dimension_numbers = #tpu.dot_dimension_numbers<[1], [0], [0], [1], [0, 0, 1, 1], [], []>} : vector<8x256xbf16>, vector<256x128xbf16>, vector<8x128xf32> -> vector<8x128xf32>
    %7 = vector.broadcast %4 : vector<1x128xf32> to vector<8x128xf32>
    %8 = arith.addf %6, %7 : vector<8x128xf32>
    %c0_6 = arith.constant 0 : index
    %c0_7 = arith.constant 0 : index
    %9 = vector.load %arg9[%c0_6, %c0_7] : memref<8x128xf32, #tpu.memory_space<vmem>>, vector<8x128xf32>
    tpu.vector_store %arg9[%c0_6, %c0_7], %8 {strides = array<i32>} : memref<8x128xf32, #tpu.memory_space<vmem>>, vector<8x128xf32>,
    return
  }
  func.func @transform_0(%arg0: i32, %arg1: i32) -> (i32, i32) {
    %c0_i32 = arith.constant 0 : i32
    %c0_i32_0 = arith.constant 0 : i32
    return %arg0, %c0_i32 : i32, i32
  }
  func.func @transform_1(%arg0: i32, %arg1: i32) -> (i32, i32) {
    %c0_i32 = arith.constant 0 : i32
    %c0_i32_0 = arith.constant 0 : i32
    %c0_i32_1 = arith.constant 0 : i32
    return %c0_i32, %c0_i32_0 : i32, i32
  }
  func.func @transform_2(%arg0: i32, %arg1: i32) -> (i32, i32) {
    %c0_i32 = arith.constant 0 : i32
    %c0_i32_0 = arith.constant 0 : i32
    %c0_i32_1 = arith.constant 0 : i32
    return %c0_i32, %c0_i32_0 : i32, i32
  }
  func.func @transform_3(%arg0: i32, %arg1: i32) -> (i32, i32) {
    %c0_i32 = arith.constant 0 : i32
    %c0_i32_0 = arith.constant 0 : i32
    %c0_i32_1 = arith.constant 0 : i32
    return %c0_i32, %c0_i32_0 : i32, i32
  }
  func.func @transform_4(%arg0: i32, %arg1: i32) -> (i32, i32) {
    %c0_i32 = arith.constant 0 : i32
    %c0_i32_0 = arith.constant 0 : i32
    %c0_i32_1 = arith.constant 0 : i32
    return %c0_i32, %c0_i32_0 : i32, i32
  }
  func.func @transform_5(%arg0: i32, %arg1: i32) -> (i32, i32) {
    %c0_i32 = arith.constant 0 : i32
    %c0_i32_0 = arith.constant 0 : i32
    return %c0_i32, %arg1 : i32, i32
  }
  func.func @transform_6(%arg0: i32, %arg1: i32) -> (i32, i32) {
    %c0_i32 = arith.constant 0 : i32
    %c0_i32_0 = arith.constant 0 : i32
    return %c0_i32, %arg1 : i32, i32
  }
  func.func @transform_7(%arg0: i32, %arg1: i32) -> (i32, i32) {
    %c0_i32 = arith.constant 0 : i32
    return %arg0, %arg1 : i32, i32
  }
}

</mosaic_0001>

<bundles_post_ra>
// kernel: tpu_custom_call.1
= control target key start
LH: loop header
LB: loop body
LE: loop exit
PB: predicated region body
PF: predicated region fallthrough
CT: control target
= control target key end

     0   :  { %12 = vsyncpa [#allocation4], 0  ;;  %s964_s0 = inlined_call_operand.hbm [shape: bf16[8,128], index: 0, kind: input, shape index: {}]   ;;  %s965_s1 = inlined_call_operand.hbm [shape: bf16[128,128], index: 1, kind: input, shape index: {}]   ;;  %s966_s2 = inlined_call_operand.vmem [shape: f32[1,128], index: 2, kind: input, shape index: {}]   ;;  %s967_s3 = inlined_call_operand.hbm [shape: bf16[128,256], index: 3, kind: input, shape index: {}]   ;;  %s968_s4 = inlined_call_operand.vmem [shape: f32[1,256], index: 4, kind: input, shape index: {}]   ;;  %s969_s5 = inlined_call_operand.hbm [shape: bf16[256,128], index: 5, kind: input, shape index: {}]   ;;  %s970_s6 = inlined_call_operand.vmem [shape: f32[1,128], index: 6, kind: input, shape index: {}]   ;;  %s971_s7 = inlined_call_operand.hbm [shape: f32[8,128], index: 7, kind: output, shape index: {}]  }
   0x1   :  { %13 = vsyncpa [#allocation7], 0 }
   0x2   :  { %14 = vsyncpa [#allocation10], 0 }
   0x3   :  { %15 = vsyncpa [#allocation5], 0  ;;  %s837_s24 = smov [#allocation6]   ;;  %s719_s28 = scalar_lea.hbm %s965_s1, 1024 }
   0x4   :  { %s31_s25 = sshll.u32 %s837_s24, 4  ;;  %p720_p0 = scmp.ne.s32.totalorder %s965_s1, %s719_s28  ;;  %s32_s25 = int_to_ptr.vmem [resolvable:$true] %s31_s25 }
   0x5   :  { %p723_p1 = scmp.lt.u32.totalorder %s719_s28, %s965_s1 }
   0x7   :  { %p725_p2 = pnand %p723_p1, %p720_p0 }
   0x9   :  { %728 = shalt.err (!%p725_p2)
}
   0xa   :  { %s729_s10 = scalar_lea.vmem %s32_s25, 1024  ;;  %p734_p4 = scmp.lt.s32.totalorder %s32_s25, %s32_s25 }
   0xb   :  { %p730_p3 = scmp.ne.s32.totalorder %s32_s25, %s729_s10  ;;  %p735_p5 = scmp.lt.s32.totalorder %s729_s10, %s729_s10 }
   0xd   :  { %p736_p6 = por %p735_p5, %p734_p4 }
   0xf   :  { %p737_p7 = pnand %p736_p6, %p730_p3 }
  0x11   :  { %740 = shalt.err (!%p737_p7)
}
  0x12   :  { %s838_s11 = smov 64   ;;  %s839_s12 = smov 4  }
  0x13   :  { %37 = dma.hbm_to_vmem [thread:$0]  %s965_s1, 1024, %s32_s25, [#allocation7], %s838_s11, %s838_s11, %s839_s12  }
  0x14   :  { %s840_s15 = smov [#allocation3]   ;;  %s841_s17 = smov [#allocation8]  }
  0x15   :  { %s22_s16 = sshll.u32 %s840_s15, 4  ;;  %s45_s18 = sshll.u32 %s841_s17, 4  ;;  %s23_s16 = int_to_ptr.vmem [resolvable:$true] %s22_s16  ;;  %s46_s18 = int_to_ptr.vmem [resolvable:$true] %s45_s18 }
  0x16   :  { %s741_s21 = scalar_lea.hbm %s964_s0, 64 }
  0x17   :  { %p742_p8 = scmp.ne.s32.totalorder %s964_s0, %s741_s21  ;;  %p745_p9 = scmp.lt.u32.totalorder %s741_s21, %s964_s0 }
  0x19   :  { %p747_p10 = pnand %p745_p9, %p742_p8 }
  0x1b   :  { %750 = shalt.err (!%p747_p10)
}
  0x1c   :  { %s751_s1 = scalar_lea.vmem %s23_s16, 64  ;;  %p756_p12 = scmp.lt.s32.totalorder %s23_s16, %s23_s16 }
  0x1d   :  { %p752_p11 = scmp.ne.s32.totalorder %s23_s16, %s751_s1  ;;  %p757_p13 = scmp.lt.s32.totalorder %s751_s1, %s751_s1 }
  0x1f   :  { %p758_p0 = por %p757_p13, %p756_p12 }
  0x21   :  { %p759_p1 = pnand %p758_p0, %p752_p11 }
  0x23   :  { %762 = shalt.err (!%p759_p1)
}
  0x24   :  { %25 = dma.hbm_to_vmem [thread:$0]  %s964_s0, 64, %s23_s16, [#allocation4]  }
  0x25   :  { %s763_s30 = scalar_lea.hbm %s967_s3, 2048 }
  0x26   :  { %p764_p2 = scmp.ne.s32.totalorder %s967_s3, %s763_s30  ;;  %p767_p3 = scmp.lt.u32.totalorder %s763_s30, %s967_s3 }
  0x28   :  { %p769_p4 = pnand %p767_p3, %p764_p2 }
  0x2a   :  { %772 = shalt.err (!%p769_p4)
}
  0x2b   :  { %s773_s14 = scalar_lea.vmem %s46_s18, 2048  ;;  %p778_p6 = scmp.lt.s32.totalorder %s46_s18, %s46_s18 }
  0x2c   :  { %p774_p5 = scmp.ne.s32.totalorder %s46_s18, %s773_s14  ;;  %p779_p7 = scmp.lt.s32.totalorder %s773_s14, %s773_s14 }
  0x2e   :  { %p780_p8 = por %p779_p7, %p778_p6 }
  0x30   :  { %p781_p9 = pnand %p780_p8, %p774_p5 }
  0x32   :  { %784 = shalt.err (!%p781_p9)
}
  0x33   :  { %s842_s0 = smov 128   ;;  %s843_s15 = smov 8  }
  0x34   :  { %51 = dma.hbm_to_vmem [thread:$0]  %s967_s3, 2048, %s46_s18, [#allocation7], %s842_s0, %s842_s0, %s843_s15  }
  0x35   :  { %s844_s19 = smov [#allocation9]   ;;  %s785_s23 = scalar_lea.hbm %s969_s5, 2048 }
  0x36   :  { %s59_s20 = sshll.u32 %s844_s19, 4  ;;  %p786_p10 = scmp.ne.s32.totalorder %s969_s5, %s785_s23  ;;  %s60_s20 = int_to_ptr.vmem [resolvable:$true] %s59_s20 }
  0x37   :  { %p789_p11 = scmp.lt.u32.totalorder %s785_s23, %s969_s5 }
  0x39   :  { %p791_p12 = pnand %p789_p11, %p786_p10 }
  0x3b   :  { %794 = shalt.err (!%p791_p12)
}
  0x3c   :  { %s795_s27 = scalar_lea.vmem %s60_s20, 2048  ;;  %p800_p0 = scmp.lt.s32.totalorder %s60_s20, %s60_s20 }
  0x3d   :  { %p796_p13 = scmp.ne.s32.totalorder %s60_s20, %s795_s27  ;;  %p801_p1 = scmp.lt.s32.totalorder %s795_s27, %s795_s27 }
  0x3f   :  { %p802_p2 = por %p801_p1, %p800_p0 }
  0x41   :  { %p803_p3 = pnand %p802_p2, %p796_p13 }
  0x43   :  { %806 = shalt.err (!%p803_p3)
}
  0x44   :  { %65 = dma.hbm_to_vmem [thread:$0]  %s969_s5, 2048, %s60_s20, [#allocation10], %s838_s11, %s838_s11, %s839_s12  }
  0x45   :  { %829 = dma.done.wait [#allocation4], 64  }
  0x46   :  { %830 = vsyncadd [#allocation4], 4294967232 }
  0x47   :  { %831 = dma.done.wait [#allocation7], 3072  }
  0x48   :  { %832 = vsyncadd [#allocation7], 4294964224 }
  0x49   :  { %833 = dma.done.wait [#allocation10], 2048  }
  0x4a   :  { %834 = vsyncadd [#allocation10], 4294965248  ;;  %v845_v0 = vmov 0.0   ;;  %vm846_vm0 = vmmov 0   ;;  %v671_v1 = vld [vmem:[#allocation6] sm:$0xff]   ;;  %v672_v2 = vld [vmem:[#allocation6 + $0x8] sm:$0xff]   ;;  %v217_v51 = vlaneseq }
  0x4b   :  { %639 = vmatprep.subr.bf16.mxu0 %v845_v0  ;;  %655 = vmatprep.mubr.msk.bf16.mxu0 %vm846_vm0, %v845_v0  ;;  %v673_v3 = vld [vmem:[#allocation6 + $0x10] sm:$0xff]   ;;  %v679_v4 = vld [vmem:[#allocation8 + $0x4] ss:$8 sps:$4 sm:$0xff]   ;;  %v681_v5 = vld [vmem:[#allocation8] ss:$8 sps:$4 sm:$0xff]   ;;  %v847_v26 = vmov 0  }
  0x4c   :  { %640 = vmatpush3.bf16.msra.mxu0 %v671_v1  ;;  %v674_v6 = vld [vmem:[#allocation6 + $0x18] sm:$0xff]   ;;  %307 = vmatprep.subr.bf16.mxu1 %v679_v4  ;;  %v685_v9 = vld [vmem:[#allocation8 + $0x24] ss:$8 sps:$4 sm:$0xff]   ;;  %v687_v11 = vld [vmem:[#allocation8 + $0x20] ss:$8 sps:$4 sm:$0xff]   ;;  %v218_v52 = vshrl.u32 %v217_v51, 7 }
  0x4d   :  { %641 = vmatprep.subr.bf16.mxu0 %v845_v0  ;;  %v682_v7 = vld [vmem:[#allocation8 + $0x14] ss:$8 sps:$4 sm:$0xff]   ;;  %308 = vmatpush1.bf16.msra.mxu1 %v681_v5  ;;  %v684_v8 = vld [vmem:[#allocation8 + $0x10] ss:$8 sps:$4 sm:$0xff]   ;;  %v675_v10 = vld [vmem:[#allocation6 + $0x20] sm:$0xff]  }
  0x4e   :  { %309 = vmatprep.subr.bf16.mxu1 %v682_v7  ;;  %v676_v12 = vld [vmem:[#allocation6 + $0x28] sm:$0xff]   ;;  %v688_v13 = vld [vmem:[#allocation8 + $0x34] ss:$8 sps:$4 sm:$0xff]   ;;  %v690_v14 = vld [vmem:[#allocation8 + $0x30] ss:$8 sps:$4 sm:$0xff]   ;;  %339 = vmatprep.mubr.bf16.mxu1 %v847_v26  ;;  %v219_v53 = vsub.s32 0, %v218_v52 }
  0x4f   :  { %v691_v15 = vld [vmem:[#allocation8 + $0x44] ss:$8 sps:$4 sm:$0xff]   ;;  %v677_v16 = vld [vmem:[#allocation6 + $0x30] sm:$0xff]   ;;  %v693_v17 = vld [vmem:[#allocation8 + $0x40] ss:$8 sps:$4 sm:$0xff]   ;;  %v223_v55 = vsub.s32 1, %v218_v52 }
  0x50   :  { %642 = vmatpush3.bf16.msra.mxu0 %v672_v2  ;;  %v694_v18 = vld [vmem:[#allocation8 + $0x54] ss:$8 sps:$4 sm:$0xff]   ;;  %v696_v20 = vld [vmem:[#allocation8 + $0x50] ss:$8 sps:$4 sm:$0xff]   ;;  %v697_v21 = vld [vmem:[#allocation8 + $0x64] ss:$8 sps:$4 sm:$0xff]  }
  0x51   :  { %643 = vmatprep.subr.bf16.mxu0 %v845_v0  ;;  %310 = vmatpush1.bf16.msra.mxu1 %v684_v8  ;;  %v678_v19 = vld [vmem:[#allocation6 + $0x38] sm:$0xff]   ;;  %v699_v23 = vld [vmem:[#allocation8 + $0x60] ss:$8 sps:$4 sm:$0xff]   ;;  %v707_v31 = vld [vmem:[#allocation9 + $0x50] sm:$0xff]  }
  0x52   :  { %311 = vmatprep.subr.bf16.mxu1 %v685_v9  ;;  %v119_v22 = vld [vmem:[#allocation3] sm:$0xf]  ;;  %v702_v25 = vld [vmem:[#allocation8 + $0x70] ss:$8 sps:$4 sm:$0xff]   ;;  %v703_v27 = vld [vmem:[#allocation9 + $0x40] sm:$0xff]  }
  0x53   :  { %v700_v24 = vld [vmem:[#allocation8 + $0x74] ss:$8 sps:$4 sm:$0xff]   ;;  %v704_v28 = vld [vmem:[#allocation9] sm:$0xff]   ;;  %v705_v29 = vld [vmem:[#allocation9 + $0x48] sm:$0xff]  }
  0x54   :  { %644 = vmatpush3.bf16.msra.mxu0 %v673_v3  ;;  %v706_v30 = vld [vmem:[#allocation9 + $0x8] sm:$0xff]   ;;  %v708_v32 = vld [vmem:[#allocation9 + $0x10] sm:$0xff]   ;;  %v709_v33 = vld [vmem:[#allocation9 + $0x58] sm:$0xff]  }
  0x55   :  { %645 = vmatprep.subr.bf16.mxu0 %v845_v0  ;;  %312 = vmatpush1.bf16.msra.mxu1 %v687_v11  ;;  %v710_v34 = vld [vmem:[#allocation9 + $0x18] sm:$0xff]   ;;  %v711_v35 = vld [vmem:[#allocation9 + $0x60] sm:$0xff]   ;;  %v713_v37 = vld [vmem:[#allocation9 + $0x68] sm:$0xff]  }
  0x56   :  { %313 = vmatprep.subr.bf16.mxu1 %v688_v13  ;;  %v712_v36 = vld [vmem:[#allocation9 + $0x20] sm:$0xff]   ;;  %v714_v38 = vld [vmem:[#allocation9 + $0x28] sm:$0xff]   ;;  %v560_v39 = vld [vmem:[%s966_s2] ss:$0 sm:$0xff] }
  0x57   :  { %v715_v47 = vld [vmem:[#allocation9 + $0x70] sm:$0xff]   ;;  %v717_v49 = vld [vmem:[#allocation9 + $0x78] sm:$0xff]  }
  0x58   :  { %646 = vmatpush3.bf16.msra.mxu0 %v674_v6  ;;  %v716_v48 = vld [vmem:[#allocation9 + $0x30] sm:$0xff]   ;;  %v718_v50 = vld [vmem:[#allocation9 + $0x38] sm:$0xff]  }
  0x59   :  { %647 = vmatprep.subr.bf16.mxu0 %v845_v0  ;;  %314 = vmatpush1.bf16.msra.mxu1 %v690_v14  ;;  %v118_v54 = vld [vmem:[%s968_s4] sm:$0x3]  ;;  %s848_s4 = smov [#allocation11]  }
  0x5a   :  { %315 = vmatprep.subr.bf16.mxu1 %v691_v15  ;;  %v220_v56 = vrot.slane %v118_v54, %v219_v53  ;;  %v224_v57 = vrot.slane %v118_v54, %v223_v55  ;;  %v586_v5 = vld [vmem:[%s970_s6] ss:$0 sm:$0xff]  ;;  %s549_s30 = sshll.u32 %s848_s4, 4  ;;  %s550_s30 = int_to_ptr.vmem [resolvable:$true] %s549_s30 }
  0x5b   :  { %s807_s8 = scalar_lea.vmem %s550_s30, 128  ;;  %p812_p5 = scmp.lt.s32.totalorder %s550_s30, %s550_s30 }
  0x5c   :  { %648 = vmatpush3.bf16.msra.mxu0 %v675_v10  ;;  %p808_p4 = scmp.ne.s32.totalorder %s550_s30, %s807_s8  ;;  %p813_p6 = scmp.lt.s32.totalorder %s807_s8, %s807_s8 }
  0x5d   :  { %649 = vmatprep.subr.bf16.mxu0 %v845_v0  ;;  %316 = vmatpush1.bf16.msra.mxu1 %v693_v17 }
  0x5e   :  { %317 = vmatprep.subr.bf16.mxu1 %v694_v18  ;;  %p814_p7 = por %p813_p6, %p812_p5 }
  0x60   :  { %650 = vmatpush3.bf16.msra.mxu0 %v676_v12  ;;  %p815_p8 = pnand %p814_p7, %p808_p4 }
  0x61   :  { %651 = vmatprep.subr.bf16.mxu0 %v845_v0  ;;  %318 = vmatpush1.bf16.msra.mxu1 %v696_v20 }
  0x62   :  { %319 = vmatprep.subr.bf16.mxu1 %v697_v21 }
  0x64   :  { %652 = vmatpush3.bf16.msra.mxu0 %v677_v16 }
  0x65   :  { %653 = vmatprep.subr.bf16.mxu0 %v845_v0  ;;  %320 = vmatpush1.bf16.msra.mxu1 %v699_v23 }
  0x66   :  { %321 = vmatprep.subr.bf16.mxu1 %v700_v24 }
  0x68   :  { %654 = vmatpush3.bf16.msra.mxu0 %v678_v19 }
  0x69   :  { %322 = vmatpush1.bf16.msra.mxu1 %v702_v25  ;;  %617 = vmatprep.subr.bf16.mxu0 %v703_v27 }
  0x6b   :  { %656 = vmatmul.mubr.bf16.vlgmr.msra.gmra.mrb[0].mxu0 %v119_v22 }
  0x6c   :  { %618 = vmatpush3.bf16.msra.mxu0 %v704_v28 }
  0x6d   :  { %619 = vmatprep.subr.bf16.mxu0 %v705_v29 }
  0x70   :  { %620 = vmatpush3.bf16.msra.mxu0 %v706_v30 }
  0x71   :  { %621 = vmatprep.subr.bf16.mxu0 %v707_v31 }
  0x74   :  { %622 = vmatpush3.bf16.msra.mxu0 %v708_v32 }
  0x75   :  { %623 = vmatprep.subr.bf16.mxu0 %v709_v33 }
  0x78   :  { %624 = vmatpush3.bf16.msra.mxu0 %v710_v34 }
  0x79   :  { %625 = vmatprep.subr.bf16.mxu0 %v711_v35 }
  0x7c   :  { %626 = vmatpush3.bf16.msra.mxu0 %v712_v36 }
  0x7d   :  { %627 = vmatprep.subr.bf16.mxu0 %v713_v37 }
  0x80   :  { %628 = vmatpush3.bf16.msra.mxu0 %v714_v38 }
  0x81   :  { %629 = vmatprep.subr.bf16.mxu0 %v715_v47 }
  0x84   :  { %630 = vmatpush3.bf16.msra.mxu0 %v716_v48 }
  0x85   :  { %631 = vmatprep.subr.bf16.mxu0 %v717_v49 }
  0x88   :  { %632 = vmatpush3.bf16.msra.mxu0 %v718_v50 }
 0x13e   :  { %v208_v40 = vpop.f32.mrb[0].mxu0 }
 0x13f   :  { %v209_v41 = vadd.f32 %v560_v39, %v208_v40  ;;  %v657_v42 = vpop.f32.mrb[1].mxu0 }
 0x140   :  { %v211_v43 = vpop.f32.mrb[2].mxu0 }
 0x141   :  { %v214_v44 = vmax.f32 %v209_v41, 0.0  ;;  %v658_v45 = vpop.f32.mrb[3].mxu0 }
 0x143   :  { %v215_v46 = vpack.c.bf16 %v214_v44, %v214_v44 }
 0x145   :  { %340 = vmatmul.mubr.bf16.vlgmr.msra.gmra.mrb[0].mxu1 %v215_v46 }
 0x218   :  { %v341_v58 = vpop.f32.mrb[0].mxu1 }
 0x219   :  { %v342_v59 = vadd.f32 %v341_v58, %v220_v56  ;;  %v343_v60 = vpop.f32.mrb[1].mxu1 }
 0x21a   :  { %v344_v61 = vadd.f32 %v343_v60, %v224_v57  ;;  %v345_v62 = vpop.f32.mrb[2].mxu1 }
 0x21b   :  { %v348_v63 = vmax.f32 %v342_v59, 0.0  ;;  %v346_v0 = vpop.f32.mrb[3].mxu1 }
 0x21c   :  { %v349_v1 = vmax.f32 %v344_v61, 0.0 }
 0x21d   :  { %v606_v3 = vpack.c.bf16 %v348_v63, %v348_v63 }
 0x21e   :  { %v607_v2 = vpack.c.bf16 %v349_v1, %v349_v1 }
 0x220   :  { %534 = vmatprep.mubr.bf16.mxu0 %v607_v2 }
 0x221   :  { %535 = vmatmul.mubr.bf16.vlgmr.msra.gmra.mrb[4].mxu0 %v606_v3 }
 0x2f4   :  { %v633_v4 = vpop.f32.mrb[4].mxu0 }
 0x2f5   :  { %v634_v6 = vpop.f32.mrb[5].mxu0 }
 0x2f6   :  { %v635_v7 = vadd.f32 %v634_v6, %v633_v4  ;;  %v636_v8 = vpop.f32.mrb[6].mxu0 }
 0x2f7   :  { %v637_v9 = vpop.f32.mrb[7].mxu0 }
 0x2f8   :  { %v537_v10 = vadd.f32 %v635_v7, %v586_v5 }
 0x2fa   :  { %542 = vst [vmem:[#allocation11] sm:$0xff] %v537_v10 }
 0x2fb   :  { %818 = shalt.err (!%p815_p8)
}
 0x2fc   :  { %s819_s6 = scalar_lea.hbm %s971_s7, 128 }
 0x2fd   :  { %p820_p9 = scmp.ne.s32.totalorder %s971_s7, %s819_s6  ;;  %p823_p10 = scmp.lt.u32.totalorder %s819_s6, %s971_s7 }
 0x2ff   :  { %p825_p11 = pnand %p823_p10, %p820_p9 }
 0x301   :  { %828 = shalt.err (!%p825_p11)
}
 0x302   :  { %552 = dma.vmem_to_hbm [thread:$0]  %s550_s30, 128, %s971_s7, [#allocation5]  }
 0x303   :  { %835 = dma.done.wait [#allocation5], 128  }
 0x304   :  { %836 = vsyncadd [#allocation5], 4294967168 }
 0x305   :  { %556 = vsyncpa [#allocation4], 1 }
 0x306   :  { %557 = vsyncpa [#allocation7], 1 }
 0x307   :  { %558 = vsyncpa [#allocation10], 1 }
 0x308   :  { %559 = vsyncpa [#allocation5], 1 }

// kernel: tpu_custom_call.1
= control target key start
LH: loop header
LB: loop body
LE: loop exit
PB: predicated region body
PF: predicated region fallthrough
CT: control target
= control target key end

     0   :  { %12 = vsyncpa [#allocation4], 0  ;;  %s964_s0 = inlined_call_operand.hbm [shape: bf16[8,128], index: 0, kind: input, shape index: {}]   ;;  %s965_s1 = inlined_call_operand.hbm [shape: bf16[128,128], index: 1, kind: input, shape index: {}]   ;;  %s966_s2 = inlined_call_operand.vmem [shape: f32[1,128], index: 2, kind: input, shape index: {}]   ;;  %s967_s3 = inlined_call_operand.hbm [shape: bf16[128,256], index: 3, kind: input, shape index: {}]   ;;  %s968_s4 = inlined_call_operand.vmem [shape: f32[1,256], index: 4, kind: input, shape index: {}]   ;;  %s969_s5 = inlined_call_operand.hbm [shape: bf16[256,128], index: 5, kind: input, shape index: {}]   ;;  %s970_s6 = inlined_call_operand.vmem [shape: f32[1,128], index: 6, kind: input, shape index: {}]   ;;  %s971_s7 = inlined_call_operand.hbm [shape: f32[8,128], index: 7, kind: output, shape index: {}]  }
   0x1   :  { %13 = vsyncpa [#allocation7], 0 }
   0x2   :  { %14 = vsyncpa [#allocation10], 0 }
   0x3   :  { %15 = vsyncpa [#allocation5], 0  ;;  %s837_s24 = smov [#allocation6]   ;;  %s719_s28 = scalar_lea.hbm %s965_s1, 1024 }
   0x4   :  { %s31_s25 = sshll.u32 %s837_s24, 4  ;;  %p720_p0 = scmp.ne.s32.totalorder %s965_s1, %s719_s28  ;;  %s32_s25 = int_to_ptr.vmem [resolvable:$true] %s31_s25 }
   0x5   :  { %p723_p1 = scmp.lt.u32.totalorder %s719_s28, %s965_s1 }
   0x7   :  { %p725_p2 = pnand %p723_p1, %p720_p0 }
   0x9   :  { %728 = shalt.err (!%p725_p2)
}
   0xa   :  { %s729_s10 = scalar_lea.vmem %s32_s25, 1024  ;;  %p734_p4 = scmp.lt.s32.totalorder %s32_s25, %s32_s25 }
   0xb   :  { %p730_p3 = scmp.ne.s32.totalorder %s32_s25, %s729_s10  ;;  %p735_p5 = scmp.lt.s32.totalorder %s729_s10, %s729_s10 }
   0xd   :  { %p736_p6 = por %p735_p5, %p734_p4 }
   0xf   :  { %p737_p7 = pnand %p736_p6, %p730_p3 }
  0x11   :  { %740 = shalt.err (!%p737_p7)
}
  0x12   :  { %s838_s11 = smov 64   ;;  %s839_s12 = smov 4  }
  0x13   :  { %37 = dma.hbm_to_vmem [thread:$0]  %s965_s1, 1024, %s32_s25, [#allocation7], %s838_s11, %s838_s11, %s839_s12  }
  0x14   :  { %s840_s15 = smov [#allocation3]   ;;  %s841_s17 = smov [#allocation8]  }
  0x15   :  { %s22_s16 = sshll.u32 %s840_s15, 4  ;;  %s45_s18 = sshll.u32 %s841_s17, 4  ;;  %s23_s16 = int_to_ptr.vmem [resolvable:$true] %s22_s16  ;;  %s46_s18 = int_to_ptr.vmem [resolvable:$true] %s45_s18 }
  0x16   :  { %s741_s21 = scalar_lea.hbm %s964_s0, 64 }
  0x17   :  { %p742_p8 = scmp.ne.s32.totalorder %s964_s0, %s741_s21  ;;  %p745_p9 = scmp.lt.u32.totalorder %s741_s21, %s964_s0 }
  0x19   :  { %p747_p10 = pnand %p745_p9, %p742_p8 }
  0x1b   :  { %750 = shalt.err (!%p747_p10)
}
  0x1c   :  { %s751_s1 = scalar_lea.vmem %s23_s16, 64  ;;  %p756_p12 = scmp.lt.s32.totalorder %s23_s16, %s23_s16 }
  0x1d   :  { %p752_p11 = scmp.ne.s32.totalorder %s23_s16, %s751_s1  ;;  %p757_p13 = scmp.lt.s32.totalorder %s751_s1, %s751_s1 }
  0x1f   :  { %p758_p0 = por %p757_p13, %p756_p12 }
  0x21   :  { %p759_p1 = pnand %p758_p0, %p752_p11 }
  0x23   :  { %762 = shalt.err (!%p759_p1)
}
  0x24   :  { %25 = dma.hbm_to_vmem [thread:$0]  %s964_s0, 64, %s23_s16, [#allocation4]  }
  0x25   :  { %s763_s30 = scalar_lea.hbm %s967_s3, 2048 }
  0x26   :  { %p764_p2 = scmp.ne.s32.totalorder %s967_s3, %s763_s30  ;;  %p767_p3 = scmp.lt.u32.totalorder %s763_s30, %s967_s3 }
  0x28   :  { %p769_p4 = pnand %p767_p3, %p764_p2 }
  0x2a   :  { %772 = shalt.err (!%p769_p4)
}
  0x2b   :  { %s773_s14 = scalar_lea.vmem %s46_s18, 2048  ;;  %p778_p6 = scmp.lt.s32.totalorder %s46_s18, %s46_s18 }
  0x2c   :  { %p774_p5 = scmp.ne.s32.totalorder %s46_s18, %s773_s14  ;;  %p779_p7 = scmp.lt.s32.totalorder %s773_s14, %s773_s14 }
  0x2e   :  { %p780_p8 = por %p779_p7, %p778_p6 }
  0x30   :  { %p781_p9 = pnand %p780_p8, %p774_p5 }
  0x32   :  { %784 = shalt.err (!%p781_p9)
}
  0x33   :  { %s842_s0 = smov 128   ;;  %s843_s15 = smov 8  }
  0x34   :  { %51 = dma.hbm_to_vmem [thread:$0]  %s967_s3, 2048, %s46_s18, [#allocation7], %s842_s0, %s842_s0, %s843_s15  }
  0x35   :  { %s844_s19 = smov [#allocation9]   ;;  %s785_s23 = scalar_lea.hbm %s969_s5, 2048 }
  0x36   :  { %s59_s20 = sshll.u32 %s844_s19, 4  ;;  %p786_p10 = scmp.ne.s32.totalorder %s969_s5, %s785_s23  ;;  %s60_s20 = int_to_ptr.vmem [resolvable:$true] %s59_s20 }
  0x37   :  { %p789_p11 = scmp.lt.u32.totalorder %s785_s23, %s969_s5 }
  0x39   :  { %p791_p12 = pnand %p789_p11, %p786_p10 }
  0x3b   :  { %794 = shalt.err (!%p791_p12)
}
  0x3c   :  { %s795_s27 = scalar_lea.vmem %s60_s20, 2048  ;;  %p800_p0 = scmp.lt.s32.totalorder %s60_s20, %s60_s20 }
  0x3d   :  { %p796_p13 = scmp.ne.s32.totalorder %s60_s20, %s795_s27  ;;  %p801_p1 = scmp.lt.s32.totalorder %s795_s27, %s795_s27 }
  0x3f   :  { %p802_p2 = por %p801_p1, %p800_p0 }
  0x41   :  { %p803_p3 = pnand %p802_p2, %p796_p13 }
  0x43   :  { %806 = shalt.err (!%p803_p3)
}
  0x44   :  { %65 = dma.hbm_to_vmem [thread:$0]  %s969_s5, 2048, %s60_s20, [#allocation10], %s838_s11, %s838_s11, %s839_s12  }
  0x45   :  { %829 = dma.done.wait [#allocation4], 64  }
  0x46   :  { %830 = vsyncadd [#allocation4], 4294967232 }
  0x47   :  { %831 = dma.done.wait [#allocation7], 3072  }
  0x48   :  { %832 = vsyncadd [#allocation7], 4294964224 }
  0x49   :  { %833 = dma.done.wait [#allocation10], 2048  }
  0x4a   :  { %834 = vsyncadd [#allocation10], 4294965248  ;;  %v845_v0 = vmov 0.0   ;;  %vm846_vm0 = vmmov 0   ;;  %v671_v1 = vld [vmem:[#allocation6] sm:$0xff]   ;;  %v672_v2 = vld [vmem:[#allocation6 + $0x8] sm:$0xff]   ;;  %v217_v51 = vlaneseq }
  0x4b   :  { %639 = vmatprep.subr.bf16.mxu0 %v845_v0  ;;  %655 = vmatprep.mubr.msk.bf16.mxu0 %vm846_vm0, %v845_v0  ;;  %v673_v3 = vld [vmem:[#allocation6 + $0x10] sm:$0xff]   ;;  %v679_v4 = vld [vmem:[#allocation8 + $0x4] ss:$8 sps:$4 sm:$0xff]   ;;  %v681_v5 = vld [vmem:[#allocation8] ss:$8 sps:$4 sm:$0xff]   ;;  %v847_v26 = vmov 0  }
  0x4c   :  { %640 = vmatpush3.bf16.msra.mxu0 %v671_v1  ;;  %v674_v6 = vld [vmem:[#allocation6 + $0x18] sm:$0xff]   ;;  %307 = vmatprep.subr.bf16.mxu1 %v679_v4  ;;  %v685_v9 = vld [vmem:[#allocation8 + $0x24] ss:$8 sps:$4 sm:$0xff]   ;;  %v687_v11 = vld [vmem:[#allocation8 + $0x20] ss:$8 sps:$4 sm:$0xff]   ;;  %v218_v52 = vshrl.u32 %v217_v51, 7 }
  0x4d   :  { %641 = vmatprep.subr.bf16.mxu0 %v845_v0  ;;  %v682_v7 = vld [vmem:[#allocation8 + $0x14] ss:$8 sps:$4 sm:$0xff]   ;;  %308 = vmatpush1.bf16.msra.mxu1 %v681_v5  ;;  %v684_v8 = vld [vmem:[#allocation8 + $0x10] ss:$8 sps:$4 sm:$0xff]   ;;  %v675_v10 = vld [vmem:[#allocation6 + $0x20] sm:$0xff]  }
  0x4e   :  { %309 = vmatprep.subr.bf16.mxu1 %v682_v7  ;;  %v676_v12 = vld [vmem:[#allocation6 + $0x28] sm:$0xff]   ;;  %v688_v13 = vld [vmem:[#allocation8 + $0x34] ss:$8 sps:$4 sm:$0xff]   ;;  %v690_v14 = vld [vmem:[#allocation8 + $0x30] ss:$8 sps:$4 sm:$0xff]   ;;  %339 = vmatprep.mubr.bf16.mxu1 %v847_v26  ;;  %v219_v53 = vsub.s32 0, %v218_v52 }
  0x4f   :  { %v691_v15 = vld [vmem:[#allocation8 + $0x44] ss:$8 sps:$4 sm:$0xff]   ;;  %v677_v16 = vld [vmem:[#allocation6 + $0x30] sm:$0xff]   ;;  %v693_v17 = vld [vmem:[#allocation8 + $0x40] ss:$8 sps:$4 sm:$0xff]   ;;  %v223_v55 = vsub.s32 1, %v218_v52 }
  0x50   :  { %642 = vmatpush3.bf16.msra.mxu0 %v672_v2  ;;  %v694_v18 = vld [vmem:[#allocation8 + $0x54] ss:$8 sps:$4 sm:$0xff]   ;;  %v696_v20 = vld [vmem:[#allocation8 + $0x50] ss:$8 sps:$4 sm:$0xff]   ;;  %v697_v21 = vld [vmem:[#allocation8 + $0x64] ss:$8 sps:$4 sm:$0xff]  }
  0x51   :  { %643 = vmatprep.subr.bf16.mxu0 %v845_v0  ;;  %310 = vmatpush1.bf16.msra.mxu1 %v684_v8  ;;  %v678_v19 = vld [vmem:[#allocation6 + $0x38] sm:$0xff]   ;;  %v699_v23 = vld [vmem:[#allocation8 + $0x60] ss:$8 sps:$4 sm:$0xff]   ;;  %v707_v31 = vld [vmem:[#allocation9 + $0x50] sm:$0xff]  }
  0x52   :  { %311 = vmatprep.subr.bf16.mxu1 %v685_v9  ;;  %v119_v22 = vld [vmem:[#allocation3] sm:$0xf]  ;;  %v702_v25 = vld [vmem:[#allocation8 + $0x70] ss:$8 sps:$4 sm:$0xff]   ;;  %v703_v27 = vld [vmem:[#allocation9 + $0x40] sm:$0xff]  }
  0x53   :  { %v700_v24 = vld [vmem:[#allocation8 + $0x74] ss:$8 sps:$4 sm:$0xff]   ;;  %v704_v28 = vld [vmem:[#allocation9] sm:$0xff]   ;;  %v705_v29 = vld [vmem:[#allocation9 + $0x48] sm:$0xff]  }
  0x54   :  { %644 = vmatpush3.bf16.msra.mxu0 %v673_v3  ;;  %v706_v30 = vld [vmem:[#allocation9 + $0x8] sm:$0xff]   ;;  %v708_v32 = vld [vmem:[#allocation9 + $0x10] sm:$0xff]   ;;  %v709_v33 = vld [vmem:[#allocation9 + $0x58] sm:$0xff]  }
  0x55   :  { %645 = vmatprep.subr.bf16.mxu0 %v845_v0  ;;  %312 = vmatpush1.bf16.msra.mxu1 %v687_v11  ;;  %v710_v34 = vld [vmem:[#allocation9 + $0x18] sm:$0xff]   ;;  %v711_v35 = vld [vmem:[#allocation9 + $0x60] sm:$0xff]   ;;  %v713_v37 = vld [vmem:[#allocation9 + $0x68] sm:$0xff]  }
  0x56   :  { %313 = vmatprep.subr.bf16.mxu1 %v688_v13  ;;  %v712_v36 = vld [vmem:[#allocation9 + $0x20] sm:$0xff]   ;;  %v714_v38 = vld [vmem:[#allocation9 + $0x28] sm:$0xff]   ;;  %v560_v39 = vld [vmem:[%s966_s2] ss:$0 sm:$0xff] }
  0x57   :  { %v715_v47 = vld [vmem:[#allocation9 + $0x70] sm:$0xff]   ;;  %v717_v49 = vld [vmem:[#allocation9 + $0x78] sm:$0xff]  }
  0x58   :  { %646 = vmatpush3.bf16.msra.mxu0 %v674_v6  ;;  %v716_v48 = vld [vmem:[#allocation9 + $0x30] sm:$0xff]   ;;  %v718_v50 = vld [vmem:[#allocation9 + $0x38] sm:$0xff]  }
  0x59   :  { %647 = vmatprep.subr.bf16.mxu0 %v845_v0  ;;  %314 = vmatpush1.bf16.msra.mxu1 %v690_v14  ;;  %v118_v54 = vld [vmem:[%s968_s4] sm:$0x3]  ;;  %s848_s4 = smov [#allocation11]  }
  0x5a   :  { %315 = vmatprep.subr.bf16.mxu1 %v691_v15  ;;  %v220_v56 = vrot.slane %v118_v54, %v219_v53  ;;  %v224_v57 = vrot.slane %v118_v54, %v223_v55  ;;  %v586_v5 = vld [vmem:[%s970_s6] ss:$0 sm:$0xff]  ;;  %s549_s30 = sshll.u32 %s848_s4, 4  ;;  %s550_s30 = int_to_ptr.vmem [resolvable:$true] %s549_s30 }
  0x5b   :  { %s807_s8 = scalar_lea.vmem %s550_s30, 128  ;;  %p812_p5 = scmp.lt.s32.totalorder %s550_s30, %s550_s30 }
  0x5c   :  { %648 = vmatpush3.bf16.msra.mxu0 %v675_v10  ;;  %p808_p4 = scmp.ne.s32.totalorder %s550_s30, %s807_s8  ;;  %p813_p6 = scmp.lt.s32.totalorder %s807_s8, %s807_s8 }
  0x5d   :  { %649 = vmatprep.subr.bf16.mxu0 %v845_v0  ;;  %316 = vmatpush1.bf16.msra.mxu1 %v693_v17 }
  0x5e   :  { %317 = vmatprep.subr.bf16.mxu1 %v694_v18  ;;  %p814_p7 = por %p813_p6, %p812_p5 }
  0x60   :  { %650 = vmatpush3.bf16.msra.mxu0 %v676_v12  ;;  %p815_p8 = pnand %p814_p7, %p808_p4 }
  0x61   :  { %651 = vmatprep.subr.bf16.mxu0 %v845_v0  ;;  %318 = vmatpush1.bf16.msra.mxu1 %v696_v20 }
  0x62   :  { %319 = vmatprep.subr.bf16.mxu1 %v697_v21 }
  0x64   :  { %652 = vmatpush3.bf16.msra.mxu0 %v677_v16 }
  0x65   :  { %653 = vmatprep.subr.bf16.mxu0 %v845_v0  ;;  %320 = vmatpush1.bf16.msra.mxu1 %v699_v23 }
  0x66   :  { %321 = vmatprep.subr.bf16.mxu1 %v700_v24 }
  0x68   :  { %654 = vmatpush3.bf16.msra.mxu0 %v678_v19 }
  0x69   :  { %322 = vmatpush1.bf16.msra.mxu1 %v702_v25  ;;  %617 = vmatprep.subr.bf16.mxu0 %v703_v27 }
  0x6b   :  { %656 = vmatmul.mubr.bf16.vlgmr.msra.gmra.mrb[0].mxu0 %v119_v22 }
  0x6c   :  { %618 = vmatpush3.bf16.msra.mxu0 %v704_v28 }
  0x6d   :  { %619 = vmatprep.subr.bf16.mxu0 %v705_v29 }
  0x70   :  { %620 = vmatpush3.bf16.msra.mxu0 %v706_v30 }
  0x71   :  { %621 = vmatprep.subr.bf16.mxu0 %v707_v31 }
  0x74   :  { %622 = vmatpush3.bf16.msra.mxu0 %v708_v32 }
  0x75   :  { %623 = vmatprep.subr.bf16.mxu0 %v709_v33 }
  0x78   :  { %624 = vmatpush3.bf16.msra.mxu0 %v710_v34 }
  0x79   :  { %625 = vmatprep.subr.bf16.mxu0 %v711_v35 }
  0x7c   :  { %626 = vmatpush3.bf16.msra.mxu0 %v712_v36 }
  0x7d   :  { %627 = vmatprep.subr.bf16.mxu0 %v713_v37 }
  0x80   :  { %628 = vmatpush3.bf16.msra.mxu0 %v714_v38 }
  0x81   :  { %629 = vmatprep.subr.bf16.mxu0 %v715_v47 }
  0x84   :  { %630 = vmatpush3.bf16.msra.mxu0 %v716_v48 }
  0x85   :  { %631 = vmatprep.subr.bf16.mxu0 %v717_v49 }
  0x88   :  { %632 = vmatpush3.bf16.msra.mxu0 %v718_v50 }
 0x13e   :  { %v208_v40 = vpop.f32.mrb[0].mxu0 }
 0x13f   :  { %v209_v41 = vadd.f32 %v560_v39, %v208_v40  ;;  %v657_v42 = vpop.f32.mrb[1].mxu0 }
 0x140   :  { %v211_v43 = vpop.f32.mrb[2].mxu0 }
 0x141   :  { %v214_v44 = vmax.f32 %v209_v41, 0.0  ;;  %v658_v45 = vpop.f32.mrb[3].mxu0 }
 0x143   :  { %v215_v46 = vpack.c.bf16 %v214_v44, %v214_v44 }
 0x145   :  { %340 = vmatmul.mubr.bf16.vlgmr.msra.gmra.mrb[0].mxu1 %v215_v46 }
 0x218   :  { %v341_v58 = vpop.f32.mrb[0].mxu1 }
 0x219   :  { %v342_v59 = vadd.f32 %v341_v58, %v220_v56  ;;  %v343_v60 = vpop.f32.mrb[1].mxu1 }
 0x21a   :  { %v344_v61 = vadd.f32 %v343_v60, %v224_v57  ;;  %v345_v62 = vpop.f32.mrb[2].mxu1 }
 0x21b   :  { %v348_v63 = vmax.f32 %v342_v59, 0.0  ;;  %v346_v0 = vpop.f32.mrb[3].mxu1 }
 0x21c   :  { %v349_v1 = vmax.f32 %v344_v61, 0.0 }
 0x21d   :  { %v606_v3 = vpack.c.bf16 %v348_v63, %v348_v63 }
 0x21e   :  { %v607_v2 = vpack.c.bf16 %v349_v1, %v349_v1 }
 0x220   :  { %534 = vmatprep.mubr.bf16.mxu0 %v607_v2 }
 0x221   :  { %535 = vmatmul.mubr.bf16.vlgmr.msra.gmra.mrb[4].mxu0 %v606_v3 }
 0x2f4   :  { %v633_v4 = vpop.f32.mrb[4].mxu0 }
 0x2f5   :  { %v634_v6 = vpop.f32.mrb[5].mxu0 }
 0x2f6   :  { %v635_v7 = vadd.f32 %v634_v6, %v633_v4  ;;  %v636_v8 = vpop.f32.mrb[6].mxu0 }
 0x2f7   :  { %v637_v9 = vpop.f32.mrb[7].mxu0 }
 0x2f8   :  { %v537_v10 = vadd.f32 %v635_v7, %v586_v5 }
 0x2fa   :  { %542 = vst [vmem:[#allocation11] sm:$0xff] %v537_v10 }
 0x2fb   :  { %818 = shalt.err (!%p815_p8)
}
 0x2fc   :  { %s819_s6 = scalar_lea.hbm %s971_s7, 128 }
 0x2fd   :  { %p820_p9 = scmp.ne.s32.totalorder %s971_s7, %s819_s6  ;;  %p823_p10 = scmp.lt.u32.totalorder %s819_s6, %s971_s7 }
 0x2ff   :  { %p825_p11 = pnand %p823_p10, %p820_p9 }
 0x301   :  { %828 = shalt.err (!%p825_p11)
}
 0x302   :  { %552 = dma.vmem_to_hbm [thread:$0]  %s550_s30, 128, %s971_s7, [#allocation5]  }
 0x303   :  { %835 = dma.done.wait [#allocation5], 128  }
 0x304   :  { %836 = vsyncadd [#allocation5], 4294967168 }
 0x305   :  { %556 = vsyncpa [#allocation4], 1 }
 0x306   :  { %557 = vsyncpa [#allocation7], 1 }
 0x307   :  { %558 = vsyncpa [#allocation10], 1 }
 0x308   :  { %559 = vsyncpa [#allocation5], 1 }

</bundles_post_ra>
